<compile_context>
chip_gen: v6e
topology: v6e:2x2x1
jax: 0.10.0
libtpu: 0.0.40
codegen_flags: <defaults>
</compile_context>

<pallas_src>
import jax
import jax.numpy as jnp
from jax.experimental import pallas as pl
from jax.experimental.pallas import tpu as pltpu

IN_FEATURES = 28 * 28   # 784
OUT_FEATURES = 10


def netlin_kernel(x_ref, w_ref, b_ref, o_ref):
    # x_ref: (tb, 784) in its stored dtype, w_ref: (784, 10) same dtype,
    # b_ref: (1, 10) f32, o_ref: (tb, 10) f32.
    logits = jnp.dot(x_ref[...], w_ref[...],
                     preferred_element_type=jnp.float32) + b_ref[...]
    # Numerically-stable log_softmax along dim=1 (XLU reduce + EUP exp/log,
    # hidden under the x-read DMA that dominates this kernel).
    m = jnp.max(logits, axis=-1, keepdims=True)
    shifted = logits - m
    lse = jnp.log(jnp.sum(jnp.exp(shifted), axis=-1, keepdims=True))
    o_ref[...] = (shifted - lse).astype(o_ref.dtype)


def _round_up(n, m):
    return ((n + m - 1) // m) * m


def _device_kind():
    try:
        return jax.devices()[0].device_kind.lower()
    except Exception:
        return ""


def _pick_config(batch):
    """Return (tb, vmem_limit_bytes_or_None, dimension_semantics)."""
    kind = _device_kind()
    if "v6" in kind:
        tb_target, vmem = 4096, 64 * 1024 * 1024   # 128 MiB physical VMEM
    elif "v7" in kind:
        tb_target, vmem = 2048, None                # fits 32 MiB scoped default
    else:
        # v5e (16 MiB default scoped VMEM), v4, unknown: stay conservative.
        tb_target, vmem = 1024, None

    # Effective tile: multiple of 8, no larger than the (8-rounded) batch so
    # tiny batches don't allocate huge tiles.
    tb = max(8, min(_round_up(tb_target, 8), _round_up(batch, 8)))
    num_steps = pl.cdiv(batch, tb)

    if "v7" in kind and num_steps >= 2:
        dims = (pltpu.CORE_PARALLEL,)   # split batch tiles across both TCs
    else:
        dims = ("parallel",)
    return tb, vmem, dims


def netlin_forward(x_nchw, weight, bias):
    """x_nchw: (B, 1, 28, 28); weight: (10, 784); bias: (10,).

    Returns log_softmax(x @ W^T + b) with shape (B, 10), float32.
    x is consumed in whatever dtype it arrives in (f32 or bf16); accumulation
    is always float32 inside the kernel.
    """
    B = x_nchw.shape[0]
    x_flat = x_nchw.reshape(B, IN_FEATURES)           # torch: x.view(-1, 784)
    if x_flat.dtype not in (jnp.bfloat16, jnp.float32):
        x_flat = x_flat.astype(jnp.float32)

    w_t = weight.T.astype(x_flat.dtype)               # (784, 10); y = x @ W^T + b
    b2d = bias.reshape(1, OUT_FEATURES).astype(jnp.float32)

    tb, vmem_limit, dims = _pick_config(B)
    grid = (pl.cdiv(B, tb),)                          # ragged last block handled by Pallas

    cp_kwargs = dict(dimension_semantics=dims)
    if vmem_limit is not None:
        cp_kwargs["vmem_limit_bytes"] = vmem_limit

    out = pl.pallas_call(
        netlin_kernel,
        out_shape=jax.ShapeDtypeStruct((B, OUT_FEATURES), jnp.float32),
        grid=grid,
        in_specs=[
            pl.BlockSpec((tb, IN_FEATURES), lambda i: (i, 0)),            # streamed x tiles
            pl.BlockSpec((IN_FEATURES, OUT_FEATURES), lambda i: (0, 0)),  # resident W^T
            pl.BlockSpec((1, OUT_FEATURES), lambda i: (0, 0)),            # resident b
        ],
        out_specs=pl.BlockSpec((tb, OUT_FEATURES), lambda i: (i, 0)),
        compiler_params=pltpu.CompilerParams(**cp_kwargs),
    )(x_flat, w_t, b2d)

    return out


if __name__ == "__main__":
    key = jax.random.PRNGKey(0)
    kx, kw, kb = jax.random.split(key, 3)

    B = 2
    x = jax.random.normal(kx, (B, 1, 28, 28), dtype=jnp.float32)

    # Deterministic parameter init (shapes match nn.Linear(784, 10)):
    # weight: (out_features, in_features) = (10, 784), bias: (10,)
    bound = 1.0 / jnp.sqrt(jnp.float32(IN_FEATURES))
    weight = jax.random.uniform(
        kw, (OUT_FEATURES, IN_FEATURES), dtype=jnp.float32,
        minval=-bound, maxval=bound)
    bias = jax.random.uniform(
        kb, (OUT_FEATURES,), dtype=jnp.float32, minval=-bound, maxval=bound)

    out = netlin_forward(x, weight, bias)
    out = jax.block_until_ready(out)

    # Sanity check against a plain-JAX reference (full-precision matmul).
    ref_logits = jnp.dot(x.reshape(B, IN_FEATURES), weight.T,
                         precision=jax.lax.Precision.HIGHEST) + bias
    ref = jax.nn.log_softmax(ref_logits, axis=1)
    assert out.shape == (B, OUT_FEATURES)
    assert bool(jnp.allclose(out, ref, atol=1e-4, rtol=1e-4)), "mismatch vs reference"

    print("KERNEL_OK")
</pallas_src>

<mosaic_0001>
module attributes {stable_mosaic.version = 11 : i64} {
  func.func @netlin_kernel(%arg0: i32, %arg1: memref<8x784xf32, #tpu.memory_space<vmem>>, %arg2: memref<784x10xf32, #tpu.memory_space<vmem>>, %arg3: memref<1x10xf32, #tpu.memory_space<vmem>>, %arg4: memref<8x10xf32, #tpu.memory_space<vmem>>) attributes {dimension_semantics = [#tpu.dimension_semantics<parallel>], iteration_bounds = array<i64: 1>, scalar_prefetch = 0 : i64, scratch_operands = 0 : i64, tpu.core_type = #tpu.core_type<tc>, window_params = [{transform_indices = @transform_0, window_bounds = array<i64: 8, 784>}, {pipeline_mode = #tpu.pipeline_mode<synchronous>, transform_indices = @transform_1, window_bounds = array<i64: 784, 10>}, {pipeline_mode = #tpu.pipeline_mode<synchronous>, transform_indices = @transform_2, window_bounds = array<i64: 1, 10>}, {transform_indices = @transform_3, window_bounds = array<i64: 8, 10>}]} {
    %c0 = arith.constant 0 : index
    %c0_0 = arith.constant 0 : index
    %0 = vector.load %arg1[%c0, %c0_0] : memref<8x784xf32, #tpu.memory_space<vmem>>, vector<8x784xf32>
    %c0_1 = arith.constant 0 : index
    %c0_2 = arith.constant 0 : index
    %1 = vector.load %arg2[%c0_1, %c0_2] : memref<784x10xf32, #tpu.memory_space<vmem>>, vector<784x10xf32>
    %cst = arith.constant dense<0.000000e+00> : vector<8x10xf32>
    %2 = tpu.matmul %0, %1, %cst {dimension_numbers = #tpu.dot_dimension_numbers<[1], [0], [0], [1], [0, 0, 1, 1], [], []>} : vector<8x784xf32>, vector<784x10xf32>, vector<8x10xf32> -> vector<8x10xf32>
    %c0_3 = arith.constant 0 : index
    %c0_4 = arith.constant 0 : index
    %3 = vector.load %arg3[%c0_3, %c0_4] : memref<1x10xf32, #tpu.memory_space<vmem>>, vector<1x10xf32>
    %4 = vector.broadcast %3 : vector<1x10xf32> to vector<8x10xf32>
    %5 = arith.addf %2, %4 : vector<8x10xf32>
    %cst_5 = arith.constant dense<0xFF800000> : vector<8xf32>
    %6 = vector.multi_reduction <maximumf>, %5, %cst_5 [1] : vector<8x10xf32> to vector<8xf32>
    %7 = vector.shape_cast %6 : vector<8xf32> to vector<8x1xf32>
    %8 = vector.broadcast %7 : vector<8x1xf32> to vector<8x10xf32>
    %9 = arith.subf %5, %8 : vector<8x10xf32>
    %10 = math.exp %9 : vector<8x10xf32>
    %cst_6 = arith.constant dense<0.000000e+00> : vector<8xf32>
    %11 = vector.multi_reduction <add>, %10, %cst_6 [1] : vector<8x10xf32> to vector<8xf32>
    %12 = vector.shape_cast %11 : vector<8xf32> to vector<8x1xf32>
    %13 = math.log %12 : vector<8x1xf32>
    %14 = vector.broadcast %13 : vector<8x1xf32> to vector<8x10xf32>
    %15 = arith.subf %9, %14 : vector<8x10xf32>
    %c0_7 = arith.constant 0 : index
    %c0_8 = arith.constant 0 : index
    %16 = vector.load %arg4[%c0_7, %c0_8] : memref<8x10xf32, #tpu.memory_space<vmem>>, vector<8x10xf32>
    tpu.vector_store %arg4[%c0_7, %c0_8], %15 {strides = array<i32>} : memref<8x10xf32, #tpu.memory_space<vmem>>, vector<8x10xf32>,
    return
  }
  func.func @transform_0(%arg0: i32) -> (i32, i32) {
    %c0_i32 = arith.constant 0 : i32
    %c0_i32_0 = arith.constant 0 : i32
    return %arg0, %c0_i32 : i32, i32
  }
  func.func @transform_1(%arg0: i32) -> (i32, i32) {
    %c0_i32 = arith.constant 0 : i32
    %c0_i32_0 = arith.constant 0 : i32
    %c0_i32_1 = arith.constant 0 : i32
    return %c0_i32, %c0_i32_0 : i32, i32
  }
  func.func @transform_2(%arg0: i32) -> (i32, i32) {
    %c0_i32 = arith.constant 0 : i32
    %c0_i32_0 = arith.constant 0 : i32
    %c0_i32_1 = arith.constant 0 : i32
    return %c0_i32, %c0_i32_0 : i32, i32
  }
  func.func @transform_3(%arg0: i32) -> (i32, i32) {
    %c0_i32 = arith.constant 0 : i32
    %c0_i32_0 = arith.constant 0 : i32
    return %arg0, %c0_i32 : i32, i32
  }
}

</mosaic_0001>

<bundles_post_ra>
// kernel: tpu_custom_call.1
= control target key start
LH: loop header
LB: loop body
LE: loop exit
PB: predicated region body
PF: predicated region fallthrough
CT: control target
= control target key end

     0   :  { %8 = vsyncpa [#allocation3], 0  ;;  %v687_v29 = vmov 1983009808   ;;  %v143_v31 = vlaneseq  ;;  %vm689_vm0 = vmmov 0   ;;  %vm213_vm1 = vcmask 130048   ;;  %s1058_s0 = inlined_call_operand.vmem [shape: f32[2,784], index: 0, kind: input, shape index: {}]   ;;  %s1059_s1 = inlined_call_operand.vmem [shape: f32[784,10], index: 1, kind: input, shape index: {}]   ;;  %s1060_s2 = inlined_call_operand.vmem [shape: f32[1,10], index: 2, kind: input, shape index: {}]   ;;  %s1061_s3 = inlined_call_operand.hbm [shape: f32[2,10], index: 3, kind: output, shape index: {}]  }
   0x1   :  { %v54_v0 = vld [vmem:[%s1059_s1 + $0xf8] sm:$0xff]  ;;  %v53_v2 = vld [vmem:[%s1059_s1 + $0xf0] sm:$0xff]  ;;  %v52_v6 = vld [vmem:[%s1059_s1 + $0xe8] sm:$0xff]  ;;  %v141_v30 = vunpack.c.l.s4 %v687_v29  ;;  %v688_v29 = vmov 0.0   ;;  %vm496_vm2 = vcmask 80896  }
   0x2   :  { %v38_v1 = vld [vmem:[%s1059_s1 + $0x78] sm:$0xff]  ;;  %528 = vmatprep.subr.mxu0 %v54_v0  ;;  %v37_v4 = vld [vmem:[%s1059_s1 + $0x70] sm:$0xff]  ;;  %v36_v8 = vld [vmem:[%s1059_s1 + $0x68] sm:$0xff]  ;;  %v144_v41 = vshrl.u32 %v143_v31, 7 }
   0x3   :  { %v86_v3 = vld [vmem:[%s1059_s1 + $0x1f8] sm:$0xff]  ;;  %529 = vmatpush3.msra.mxu0 %v38_v1  ;;  %v85_v7 = vld [vmem:[%s1059_s1 + $0x1f0] sm:$0xff]  ;;  %v51_v10 = vld [vmem:[%s1059_s1 + $0xe0] sm:$0xff]  ;;  %v142_v40 = vunpack.c.0.s8 %v141_v30 }
   0x4   :  { %563 = vmatprep.subr.mxu1 %v86_v3  ;;  %v70_v5 = vld [vmem:[%s1059_s1 + $0x178] sm:$0xff]  ;;  %530 = vmatprep.subr.mxu0 %v53_v2  ;;  %v69_v9 = vld [vmem:[%s1059_s1 + $0x170] sm:$0xff]  ;;  %v84_v11 = vld [vmem:[%s1059_s1 + $0x1e8] sm:$0xff] }
   0x5   :  { %564 = vmatpush3.msra.mxu1 %v70_v5  ;;  %531 = vmatpush3.msra.mxu0 %v37_v4  ;;  %v68_v12 = vld [vmem:[%s1059_s1 + $0x168] sm:$0xff]  ;;  %v35_v13 = vld [vmem:[%s1059_s1 + $0x60] sm:$0xff]  ;;  %v50_v15 = vld [vmem:[%s1059_s1 + $0xd8] sm:$0xff]  ;;  %v857_v53 = vsub.s32 %v142_v40, %v144_v41 }
   0x6   :  { %565 = vmatprep.subr.mxu1 %v85_v7  ;;  %532 = vmatprep.subr.mxu0 %v52_v6  ;;  %v83_v14 = vld [vmem:[%s1059_s1 + $0x1e0] sm:$0xff]  ;;  %v34_v17 = vld [vmem:[%s1059_s1 + $0x58] sm:$0xff]  ;;  %v49_v19 = vld [vmem:[%s1059_s1 + $0xd0] sm:$0xff] }
   0x7   :  { %566 = vmatpush3.msra.mxu1 %v69_v9  ;;  %533 = vmatpush3.msra.mxu0 %v36_v8  ;;  %v67_v16 = vld [vmem:[%s1059_s1 + $0x160] sm:$0xff]  ;;  %v82_v18 = vld [vmem:[%s1059_s1 + $0x1d8] sm:$0xff]  ;;  %v33_v21 = vld [vmem:[%s1059_s1 + $0x50] sm:$0xff] }
   0x8   :  { %567 = vmatprep.subr.mxu1 %v84_v11  ;;  %534 = vmatprep.subr.mxu0 %v51_v10  ;;  %v66_v20 = vld [vmem:[%s1059_s1 + $0x158] sm:$0xff]  ;;  %v81_v22 = vld [vmem:[%s1059_s1 + $0x1d0] sm:$0xff]  ;;  %v48_v23 = vld [vmem:[%s1059_s1 + $0xc8] sm:$0xff] }
   0x9   :  { %568 = vmatpush3.msra.mxu1 %v68_v12  ;;  %535 = vmatpush3.msra.mxu0 %v35_v13  ;;  %v65_v24 = vld [vmem:[%s1059_s1 + $0x150] sm:$0xff]  ;;  %v32_v25 = vld [vmem:[%s1059_s1 + $0x48] sm:$0xff]  ;;  %v47_v27 = vld [vmem:[%s1059_s1 + $0xc0] sm:$0xff] }
   0xa   :  { %569 = vmatprep.subr.mxu1 %v83_v14  ;;  %536 = vmatprep.subr.mxu0 %v50_v15  ;;  %v80_v26 = vld [vmem:[%s1059_s1 + $0x1c8] sm:$0xff]  ;;  %v31_v32 = vld [vmem:[%s1059_s1 + $0x40] sm:$0xff]  ;;  %v46_v34 = vld [vmem:[%s1059_s1 + $0xb8] sm:$0xff] }
   0xb   :  { %570 = vmatpush3.msra.mxu1 %v67_v16  ;;  %537 = vmatpush3.msra.mxu0 %v34_v17  ;;  %v64_v28 = vld [vmem:[%s1059_s1 + $0x148] sm:$0xff]  ;;  %v79_v33 = vld [vmem:[%s1059_s1 + $0x1c0] sm:$0xff]  ;;  %v30_v36 = vld [vmem:[%s1059_s1 + $0x38] sm:$0xff] }
   0xc   :  { %571 = vmatprep.subr.mxu1 %v82_v18  ;;  %538 = vmatprep.subr.mxu0 %v49_v19  ;;  %v63_v35 = vld [vmem:[%s1059_s1 + $0x140] sm:$0xff]  ;;  %v78_v37 = vld [vmem:[%s1059_s1 + $0x1b8] sm:$0xff]  ;;  %v45_v38 = vld [vmem:[%s1059_s1 + $0xb0] sm:$0xff] }
   0xd   :  { %572 = vmatpush3.msra.mxu1 %v66_v20  ;;  %539 = vmatpush3.msra.mxu0 %v33_v21  ;;  %v62_v39 = vld [vmem:[%s1059_s1 + $0x138] sm:$0xff]  ;;  %v29_v42 = vld [vmem:[%s1059_s1 + $0x30] sm:$0xff]  ;;  %v44_v43 = vld [vmem:[%s1059_s1 + $0xa8] sm:$0xff] }
   0xe   :  { %573 = vmatprep.subr.mxu1 %v81_v22  ;;  %540 = vmatprep.subr.mxu0 %v48_v23  ;;  %v77_v44 = vld [vmem:[%s1059_s1 + $0x1b0] sm:$0xff]  ;;  %v28_v45 = vld [vmem:[%s1059_s1 + $0x28] sm:$0xff]  ;;  %v43_v47 = vld [vmem:[%s1059_s1 + $0xa0] sm:$0xff] }
   0xf   :  { %574 = vmatpush3.msra.mxu1 %v65_v24  ;;  %541 = vmatpush3.msra.mxu0 %v32_v25  ;;  %v61_v46 = vld [vmem:[%s1059_s1 + $0x130] sm:$0xff]  ;;  %v76_v48 = vld [vmem:[%s1059_s1 + $0x1a8] sm:$0xff]  ;;  %v27_v49 = vld [vmem:[%s1059_s1 + $0x20] sm:$0xff] }
  0x10   :  { %575 = vmatprep.subr.mxu1 %v80_v26  ;;  %542 = vmatprep.subr.mxu0 %v47_v27  ;;  %v60_v50 = vld [vmem:[%s1059_s1 + $0x128] sm:$0xff]  ;;  %v42_v51 = vld [vmem:[%s1059_s1 + $0x98] sm:$0xff]  ;;  %v75_v52 = vld [vmem:[%s1059_s1 + $0x1a0] sm:$0xff] }
  0x11   :  { %576 = vmatpush3.msra.mxu1 %v64_v28  ;;  %543 = vmatpush3.msra.mxu0 %v31_v32  ;;  %v59_v54 = vld [vmem:[%s1059_s1 + $0x120] sm:$0xff]  ;;  %v651_v56 = vld [vmem:[%s1058_s0 + $0x1c] ss:$14 sps:$4 sm:$0xff]   ;;  %v41_v58 = vld [vmem:[%s1059_s1 + $0x90] sm:$0xff] }
  0x12   :  { %577 = vmatprep.subr.mxu1 %v79_v33  ;;  %544 = vmatprep.subr.mxu0 %v46_v34  ;;  %v649_v55 = vld [vmem:[%s1058_s0] ss:$14 sps:$4 sm:$0xff]   ;;  %v26_v57 = vld [vmem:[%s1059_s1 + $0x18] sm:$0xff]  ;;  %v160_v62 = vrot.slane %v651_v56, %v857_v53  ;;  %v653_v63 = vld [vmem:[%s1058_s0 + $0x4] ss:$14 sps:$4 sm:$0xff]  }
  0x13   :  { %578 = vmatpush3.msra.mxu1 %v63_v35  ;;  %545 = vmatpush3.msra.mxu0 %v30_v36  ;;  %v74_v59 = vld [vmem:[%s1059_s1 + $0x198] sm:$0xff]  ;;  %v146_v61 = vrot.slane %v649_v55, %v857_v53  ;;  %v654_v0 = vld [vmem:[%s1058_s0 + $0x20] ss:$14 sps:$4 sm:$0xff]   ;;  %v153_v8 = vrot.slane %v653_v63, %v857_v53  ;;  %v658_v26 = vld [vmem:[%s1058_s0 + $0x24] ss:$14 sps:$4 sm:$0xff]  }
  0x14   :  { %579 = vmatprep.subr.mxu1 %v78_v37  ;;  %546 = vmatprep.subr.mxu0 %v45_v38  ;;  %v58_v60 = vld [vmem:[%s1059_s1 + $0x118] sm:$0xff]  ;;  %v25_v1 = vld [vmem:[%s1059_s1 + $0x10] sm:$0xff]  ;;  %v40_v3 = vld [vmem:[%s1059_s1 + $0x88] sm:$0xff]  ;;  %v167_v9 = vrot.slane %v654_v0, %v857_v53  ;;  %v963_v32 = vrot.slane %v658_v26, %v857_v53 }
  0x15   :  { %580 = vmatpush3.msra.mxu1 %v62_v39  ;;  %547 = vmatpush3.msra.mxu0 %v29_v42  ;;  %v73_v2 = vld [vmem:[%s1059_s1 + $0x190] sm:$0xff]  ;;  %v24_v5 = vld [vmem:[%s1059_s1 + $0x8] sm:$0xff]  ;;  %v169_v7 = vcombine.high %v146_v61, %v160_v62  ;;  %v39_v10 = vld [vmem:[%s1059_s1 + $0x80] sm:$0xff]  ;;  %v168_v13 = vcombine.low %v146_v61, %v160_v62 }
  0x16   :  { %581 = vmatprep.subr.mxu1 %v77_v44  ;;  %548 = vmatprep.subr.mxu0 %v44_v43  ;;  %v57_v4 = vld [vmem:[%s1059_s1 + $0x110] sm:$0xff]  ;;  %v72_v6 = vld [vmem:[%s1059_s1 + $0x188] sm:$0xff]  ;;  %v23_v11 = vld [vmem:[%s1059_s1] sm:$0xff]  ;;  %v171_v17 = vcombine.high %v153_v8, %v167_v9  ;;  %v170_v19 = vcombine.low %v153_v8, %v167_v9 }
  0x17   :  { %582 = vmatpush3.msra.mxu1 %v61_v46  ;;  %549 = vmatpush3.msra.mxu0 %v28_v45  ;;  %v56_v12 = vld [vmem:[%s1059_s1 + $0x108] sm:$0xff]  ;;  %v71_v14 = vld [vmem:[%s1059_s1 + $0x180] sm:$0xff]  ;;  %v118_v15 = vld [vmem:[%s1059_s1 + $0x2f8] sm:$0xff] }
  0x18   :  { %583 = vmatprep.subr.mxu1 %v76_v48  ;;  %550 = vmatprep.subr.mxu0 %v43_v47  ;;  %v55_v16 = vld [vmem:[%s1059_s1 + $0x100] sm:$0xff]  ;;  %v102_v18 = vld [vmem:[%s1059_s1 + $0x278] sm:$0xff]  ;;  %v117_v20 = vld [vmem:[%s1059_s1 + $0x2f0] sm:$0xff] }
  0x19   :  { %584 = vmatpush3.msra.mxu1 %v60_v50  ;;  %551 = vmatpush3.msra.mxu0 %v27_v49  ;;  %v101_v21 = vld [vmem:[%s1059_s1 + $0x270] sm:$0xff]  ;;  %v116_v22 = vld [vmem:[%s1059_s1 + $0x2e8] sm:$0xff]  ;;  %v115_v24 = vld [vmem:[%s1059_s1 + $0x2e0] sm:$0xff] }
  0x1a   :  { %585 = vmatprep.subr.mxu1 %v75_v52  ;;  %552 = vmatprep.subr.mxu0 %v42_v51  ;;  %v100_v23 = vld [vmem:[%s1059_s1 + $0x268] sm:$0xff]  ;;  %v99_v30 = vld [vmem:[%s1059_s1 + $0x260] sm:$0xff]  ;;  %v114_v35 = vld [vmem:[%s1059_s1 + $0x2d8] sm:$0xff] }
  0x1b   :  { %586 = vmatpush3.msra.mxu1 %v59_v54  ;;  %553 = vmatpush3.msra.mxu0 %v26_v57  ;;  %v655_v25 = vld [vmem:[%s1058_s0 + $0x8] ss:$14 sps:$4 sm:$0xff]   ;;  %v657_v27 = vld [vmem:[%s1058_s0 + $0xc] ss:$14 sps:$4 sm:$0x33]   ;;  %v119_v34 = vld [vmem:[%s1059_s1 + $0x300] sm:$0xff] }
  0x1c   :  { %587 = vmatprep.subr.mxu1 %v74_v59  ;;  %554 = vmatprep.subr.mxu0 %v41_v58  ;;  %v660_v28 = vld [vmem:[%s1058_s0 + $0x28] ss:$14 sps:$4 sm:$0x33]   ;;  %v960_v31 = vrot.slane %v655_v25, %v857_v53  ;;  %v189_v36 = vrot.slane %v657_v27, %v857_v53  ;;  %v98_v38 = vld [vmem:[%s1059_s1 + $0x258] sm:$0xff]  ;;  %v111_v45 = vld [vmem:[%s1059_s1 + $0x2c0] sm:$0xff] }
  0x1d   :  { %588 = vmatpush3.msra.mxu1 %v58_v60  ;;  %555 = vmatpush3.msra.mxu0 %v25_v1  ;;  %v120_v33 = vld [vmem:[%s1059_s1 + $0x308] sm:$0xff]  ;;  %v203_v37 = vrot.slane %v660_v28, %v857_v53  ;;  %v113_v40 = vld [vmem:[%s1059_s1 + $0x2d0] sm:$0xff]  ;;  %v95_v46 = vld [vmem:[%s1059_s1 + $0x240] sm:$0xff] }
  0x1e   :  { %589 = vmatprep.subr.mxu1 %v73_v2  ;;  %556 = vmatprep.subr.mxu0 %v40_v3  ;;  %v205_v39 = vcombine.high %v960_v31, %v963_v32  ;;  %v97_v42 = vld [vmem:[%s1059_s1 + $0x250] sm:$0xff]  ;;  %v112_v43 = vld [vmem:[%s1059_s1 + $0x2c8] sm:$0xff]  ;;  %v110_v47 = vld [vmem:[%s1059_s1 + $0x2b8] sm:$0xff]  ;;  %v204_v63 = vcombine.low %v960_v31, %v963_v32 }
  0x1f   :  { %590 = vmatpush3.msra.mxu1 %v57_v4  ;;  %557 = vmatpush3.msra.mxu0 %v24_v5  ;;  %v206_v41 = vcombine.low %v189_v36, %v203_v37  ;;  %v96_v44 = vld [vmem:[%s1059_s1 + $0x248] sm:$0xff]  ;;  %v94_v48 = vld [vmem:[%s1059_s1 + $0x238] sm:$0xff]  ;;  %v109_v49 = vld [vmem:[%s1059_s1 + $0x2b0] sm:$0xff] }
  0x20   :  { %591 = vmatprep.subr.mxu1 %v72_v6  ;;  %558 = vmatprep.subr.mxu0 %v39_v10  ;;  %v93_v50 = vld [vmem:[%s1059_s1 + $0x230] sm:$0xff]  ;;  %v108_v51 = vld [vmem:[%s1059_s1 + $0x2a8] sm:$0xff]  ;;  %v107_v53 = vld [vmem:[%s1059_s1 + $0x2a0] sm:$0xff] }
  0x21   :  { %280 = vmatprep.mubr.f32.mxu0 %v169_v7  ;;  %559 = vmatpush3.msra.mxu0 %v23_v11  ;;  %v92_v52 = vld [vmem:[%s1059_s1 + $0x228] sm:$0xff]  ;;  %v91_v54 = vld [vmem:[%s1059_s1 + $0x220] sm:$0xff]  ;;  %v106_v55 = vld [vmem:[%s1059_s1 + $0x298] sm:$0xff] }
  0x22   :  { %592 = vmatpush3.msra.mxu1 %v56_v12  ;;  %281 = vmatmul.mubr.f32.vlgmr.msra.gmra.mxu0 %v168_v13  ;;  %v90_v56 = vld [vmem:[%s1059_s1 + $0x218] sm:$0xff]  ;;  %v105_v57 = vld [vmem:[%s1059_s1 + $0x290] sm:$0xff]  ;;  %v104_v59 = vld [vmem:[%s1059_s1 + $0x288] sm:$0xff] }
  0x23   :  { %593 = vmatprep.subr.mxu1 %v71_v14  ;;  %598 = vmatprep.subr.mxu0 %v118_v15  ;;  %v89_v58 = vld [vmem:[%s1059_s1 + $0x210] sm:$0xff]  ;;  %v88_v60 = vld [vmem:[%s1059_s1 + $0x208] sm:$0xff]  ;;  %v103_v61 = vld [vmem:[%s1059_s1 + $0x280] sm:$0xff] }
  0x24   :  { %594 = vmatpush3.msra.mxu1 %v55_v16  ;;  %350 = vmatprep.mubr.f32.mxu1 %v171_v17  ;;  %v87_v62 = vld [vmem:[%s1059_s1 + $0x200] sm:$0xff] }
  0x25   :  { %599 = vmatpush3.msra.mxu0 %v102_v18  ;;  %351 = vmatmul.mubr.f32.vlgmr.msra.gmra.mxu1 %v170_v19  ;;  %v526_v7 = vld [vmem:[%s1060_s2] ss:$0 sm:$0xff] }
  0x26   :  { %600 = vmatprep.subr.mxu0 %v117_v20  ;;  %636 = vmatprep.subr.mxu1 %v688_v29 }
  0x27   :  { %601 = vmatpush3.msra.mxu0 %v101_v21  ;;  %640 = vmatprep.mubr.msk.f32.mxu1 %vm689_vm0, %v688_v29 }
  0x28   :  { %602 = vmatprep.subr.mxu0 %v116_v22  ;;  %637 = vmatpush3.msra.mxu1 %v120_v33 }
  0x29   :  { %603 = vmatpush3.msra.mxu0 %v100_v23  ;;  %638 = vmatprep.subr.mxu1 %v688_v29 }
  0x2a   :  { %604 = vmatprep.subr.mxu0 %v115_v24  ;;  %639 = vmatpush3.msra.mxu1 %v119_v34 }
  0x2b   :  { %605 = vmatpush3.msra.mxu0 %v99_v30  ;;  %420 = vmatprep.mubr.f32.mxu0 %v205_v39 }
  0x2c   :  { %606 = vmatprep.subr.mxu0 %v114_v35  ;;  %641 = vmatmul.mubr.msk.f32.vlgmr.msra.gmra.mxu1 %vm213_vm1, %v206_v41 }
  0x2d   :  { %607 = vmatpush3.msra.mxu0 %v98_v38 }
  0x2e   :  { %608 = vmatprep.subr.mxu0 %v113_v40 }
  0x2f   :  { %609 = vmatpush3.msra.mxu0 %v97_v42 }
  0x30   :  { %610 = vmatprep.subr.mxu0 %v112_v43 }
  0x31   :  { %611 = vmatpush3.msra.mxu0 %v96_v44 }
  0x32   :  { %612 = vmatprep.subr.mxu0 %v111_v45 }
  0x33   :  { %613 = vmatpush3.msra.mxu0 %v95_v46 }
  0x34   :  { %614 = vmatprep.subr.mxu0 %v110_v47 }
  0x35   :  { %615 = vmatpush3.msra.mxu0 %v94_v48 }
  0x36   :  { %616 = vmatprep.subr.mxu0 %v109_v49 }
  0x37   :  { %617 = vmatpush3.msra.mxu0 %v93_v50 }
  0x38   :  { %618 = vmatprep.subr.mxu0 %v108_v51 }
  0x39   :  { %619 = vmatpush3.msra.mxu0 %v92_v52 }
  0x3a   :  { %620 = vmatprep.subr.mxu0 %v107_v53 }
  0x3b   :  { %621 = vmatpush3.msra.mxu0 %v91_v54 }
  0x3c   :  { %622 = vmatprep.subr.mxu0 %v106_v55 }
  0x3d   :  { %623 = vmatpush3.msra.mxu0 %v90_v56 }
  0x3e   :  { %624 = vmatprep.subr.mxu0 %v105_v57 }
  0x3f   :  { %625 = vmatpush3.msra.mxu0 %v89_v58 }
  0x40   :  { %626 = vmatprep.subr.mxu0 %v104_v59 }
  0x41   :  { %627 = vmatpush3.msra.mxu0 %v88_v60 }
  0x42   :  { %628 = vmatprep.subr.mxu0 %v103_v61 }
  0x43   :  { %629 = vmatpush3.msra.mxu0 %v87_v62 }
  0x44   :  { %421 = vmatmul.mubr.f32.vlgmr.msra.gmra.mxu0 %v204_v63 }
  0xe2   :  { %v560_v4 = vpop.f32.mrf.mxu0 }
  0xe4   :  { %v561_v5 = vpop.f32.mrf.mxu0 }
  0xe5   :  { %v595_v0 = vpop.f32.mrf.mxu1  ;;  %v562_v6 = vadd.f32 %v561_v5, %v560_v4 }
  0xe7   :  { %v596_v1 = vpop.f32.mrf.mxu1  ;;  %v283_v8 = vadd.f32 %v562_v6, %v526_v7 }
  0xe8   :  { %v597_v9 = vadd.f32 %v596_v1, %v595_v0 }
  0xea   :  { %v353_v12 = vadd.f32 %v597_v9, %v283_v8 }
  0xec   :  { %v492_v2 = vpop.f32.mrf.mxu1 }
  0xee   :  { %v642_v3 = vpop.f32.mrf.mxu1 }
 0x104   :  { %v630_v10 = vpop.f32.mrf.mxu0 }
 0x106   :  { %v631_v11 = vpop.f32.mrf.mxu0 }
 0x107   :  { %v632_v13 = vadd.f32 %v631_v11, %v630_v10 }
 0x109   :  { %v423_v14 = vadd.f32 %v632_v13, %v353_v12 }
 0x10b   :  { %v493_v15 = vadd.f32 %v492_v2, %v423_v14 }
 0x10d   :  { %v497_v16 = vsel %vm496_vm2, %v493_v15, -inf }
 0x10e   :  { %498 = vmax.xlane.f32.xlu0 %v497_v16 }
 0x197   :  { %v499_v17 = vpop.xlane.xlu0 %498 }
 0x198   :  { %v500_v18 = vsub.f32 %v493_v15, %v499_v17 }
 0x19a   :  { %v501_v19 = vmul.f32 1.442695, %v500_v18 }
 0x19c   :  { %661 = vpow2.f32 %v501_v19 }
 0x1a9   :  { %v662_v20 = vpop.eup %661 }
 0x1aa   :  { %v503_v21 = vsel %vm496_vm2, %v662_v20, 0.0 }
 0x1ab   :  { %504 = vadd.xlane.f32.xlu0 %v503_v21 }
 0x234   :  { %v505_v22 = vpop.xlane.xlu0 %504 }
 0x235   :  { %663 = vlog2.f32 %v505_v22 }
 0x242   :  { %v664_v23 = vpop.eup %663 }
 0x243   :  { %v507_v24 = vmul.f32 0.6931472, %v664_v23 }
 0x245   :  { %v508_v25 = vsub.f32 %v500_v18, %v507_v24 }
 0x247   :  { %509 = vst.msk [vmem:[#allocation2] sm:$0xff] %vm496_vm2, %v508_v25 }
 0x248   :  { %514 = vsyncadd [#allocation3], 96  ;;  %s690_s1 = smov [#allocation2]  }
 0x249   :  { %s515_s2 = sshll.u32 %s690_s1, 4  ;;  %s516_s2 = int_to_ptr.vmem [resolvable:$true] %s515_s2 }
 0x24a   :  { %s665_s8 = scalar_lea.vmem %s516_s2, 32  ;;  %s669_s9 = scalar_lea.vmem %s516_s2, 128 }
 0x24b   :  { %p666_p0 = scmp.ne.s32.totalorder %s516_s2, %s665_s8  ;;  %p670_p1 = scmp.lt.s32.totalorder %s516_s2, %s516_s2 }
 0x24c   :  { %p671_p2 = scmp.lt.s32.totalorder %s669_s9, %s665_s8 }
 0x24e   :  { %p672_p3 = por %p671_p2, %p670_p1 }
 0x250   :  { %p673_p4 = pnand %p672_p3, %p666_p0 }
 0x252   :  { %676 = shalt.err (!%p673_p4)
}
 0x253   :  { %s691_s10 = smov 32   ;;  %s692_s11 = smov 2  }
 0x254   :  { %521 = dma.vmem_to_hbm [thread:$0]  %s516_s2, 32, %s1061_s3, [#allocation3], %s691_s10, %s691_s10, %s692_s11  }
 0x255   :  { %685 = dma.done.wait [#allocation3], 128  }
 0x256   :  { %686 = vsyncadd [#allocation3], 4294967168 }
 0x257   :  { %525 = vsyncpa [#allocation3], 1 }

</bundles_post_ra>
